<compile_context>
chip_gen: v5e
topology: v5e:2x2
jax: 0.10.0
libtpu: 0.0.40
codegen_flags: <defaults>
</compile_context>

<pallas_src>
import functools

import jax
import jax.numpy as jnp
from jax.experimental import pallas as pl
from jax.experimental.pallas import tpu as pltpu


# ----------------------------------------------------------------------------
# Pallas kernel: the GLiClass head (pool -> project -> normalize -> dot score)
# ----------------------------------------------------------------------------
def gliclass_head_kernel(
    text_ref,        # (TB*S, D)  bf16  flattened encoder hidden states (TB batch rows)
    cls_ref,         # (TB*C, D)  bf16  flattened extracted class-token embeddings
    pool_mat_ref,    # (TB, TB*S) f32   block-diag mean-pooling matrix (1/S entries)
    diag_mask_ref,   # (TB, TB*C) f32   keeps only same-batch (text, class) pairs
    gather_mat_ref,  # (TB*C, C)  f32   folds masked pair scores into (TB, C)
    w1t_ref, b1t_ref, w2t_ref, b2t_ref,   # text FeaturesProjector (D->P, ReLU, P->D)
    w1c_ref, b1c_ref, w2c_ref, b2c_ref,   # classes FeaturesProjector
    scale_ref,       # (1,) f32 in SMEM  logit_scale
    logits_ref,      # (TB, C)
    pooled_ref,      # (TB, D)   normalized pooled text embedding
    clsemb_ref,      # (TB*C, D) normalized projected class embeddings
):
    eps = 1e-8

    # --- GlobalAvgPooling1D as one MXU matmul over the flattened (TB*S, D) slab ---
    text = text_ref[...].astype(jnp.float32)                                   # (TB*S, D)
    pooled = jnp.dot(pool_mat_ref[...], text,
                     preferred_element_type=jnp.float32)                       # (TB, D)

    # --- text_projector: Linear -> ReLU -> Linear (dropout = identity in eval) ----
    h = jnp.dot(pooled, w1t_ref[...], preferred_element_type=jnp.float32) + b1t_ref[...]
    h = jnp.maximum(h, 0.0)                                                     # (TB, P)
    pooled_p = jnp.dot(h, w2t_ref[...], preferred_element_type=jnp.float32) + b2t_ref[...]

    # --- L2 normalize: x * rsqrt(max(||x||^2, eps^2)) == x / max(||x||, eps) ------
    ss = jnp.sum(pooled_p * pooled_p, axis=-1, keepdims=True)
    pn = pooled_p * jax.lax.rsqrt(jnp.maximum(ss, eps * eps))                   # (TB, D)

    # --- classes_projector on the flattened (TB*C, D) class embeddings ------------
    cls = cls_ref[...].astype(jnp.float32)                                      # (TB*C, D)
    hc = jnp.dot(cls, w1c_ref[...], preferred_element_type=jnp.float32) + b1c_ref[...]
    hc = jnp.maximum(hc, 0.0)                                                   # (TB*C, P)
    cls_p = jnp.dot(hc, w2c_ref[...], preferred_element_type=jnp.float32) + b2c_ref[...]
    ssc = jnp.sum(cls_p * cls_p, axis=-1, keepdims=True)
    cn = cls_p * jax.lax.rsqrt(jnp.maximum(ssc, eps * eps))                     # (TB*C, D)

    # --- 'dot' scorer on the MXU ---------------------------------------------------
    # pair[t, i] = <pn[t], cn[i]>; mask keeps same-batch pairs; gather folds to (TB, C).
    pair = jax.lax.dot_general(pn, cn, (((1,), (1,)), ((), ())),
                               preferred_element_type=jnp.float32)              # (TB, TB*C)
    logits = jnp.dot(pair * diag_mask_ref[...], gather_mat_ref[...],
                     preferred_element_type=jnp.float32) * scale_ref[0]         # (TB, C)

    logits_ref[...] = logits
    pooled_ref[...] = pn
    clsemb_ref[...] = cn


def gliclass_head(text_emb, cls_emb, params, logit_scale, *, batch_tile=8):
    """Run the Pallas head kernel.

    Returns (logits [B,C], pooled [B,D], class_emb [B,C,D]) in float32.
    """
    B, S, D = text_emb.shape
    _, C, _ = cls_emb.shape
    P = params["w1_text"].shape[1]

    # Batch tiling: TB rows per grid step (multiple of 8 => sublane-dense blocks).
    # For real batches choose TB so the grid has >=2 steps (v7x has 2 TensorCores).
    TB = batch_tile
    n_blk = pl.cdiv(B, TB)
    Bp = n_blk * TB
    if Bp != B:
        text_emb = jnp.pad(text_emb, ((0, Bp - B), (0, 0), (0, 0)))
        cls_emb = jnp.pad(cls_emb, ((0, Bp - B), (0, 0), (0, 0)))

    # bf16 streams halve HBM<->VMEM DMA; all accumulation stays f32 on the MXU.
    text_flat = text_emb.reshape(Bp * S, D).astype(jnp.bfloat16)
    cls_flat = cls_emb.reshape(Bp * C, D).astype(jnp.bfloat16)

    # Tiny constant operators built outside the kernel (constant-folded by XLA):
    pool_mat = jnp.kron(jnp.eye(TB, dtype=jnp.float32),
                        jnp.full((1, S), 1.0 / S, jnp.float32))        # (TB, TB*S)
    diag_mask = jnp.kron(jnp.eye(TB, dtype=jnp.float32),
                         jnp.ones((1, C), jnp.float32))                # (TB, TB*C)
    gather_mat = jnp.kron(jnp.ones((TB, 1), jnp.float32),
                          jnp.eye(C, dtype=jnp.float32))               # (TB*C, C)

    scale = jnp.asarray(logit_scale, jnp.float32).reshape(1)

    def const_spec(shape):
        # whole-array block, identical for every grid step (weights / small constants)
        nd = len(shape)
        return pl.BlockSpec(shape, lambda b, _n=nd: (0,) * _n)

    grid_spec = pltpu.PrefetchScalarGridSpec(
        num_scalar_prefetch=0,
        grid=(n_blk,),
        in_specs=[
            pl.BlockSpec((TB * S, D), lambda b: (b, 0)),
            pl.BlockSpec((TB * C, D), lambda b: (b, 0)),
            const_spec((TB, TB * S)),
            const_spec((TB, TB * C)),
            const_spec((TB * C, C)),
            const_spec((D, P)), const_spec((1, P)),
            const_spec((P, D)), const_spec((1, D)),
            const_spec((D, P)), const_spec((1, P)),
            const_spec((P, D)), const_spec((1, D)),
            pl.BlockSpec(memory_space=pltpu.MemorySpace.SMEM),   # logit_scale scalar
        ],
        out_specs=[
            pl.BlockSpec((TB, C), lambda b: (b, 0)),
            pl.BlockSpec((TB, D), lambda b: (b, 0)),
            pl.BlockSpec((TB * C, D), lambda b: (b, 0)),
        ],
    )
    out_shapes = (
        jax.ShapeDtypeStruct((Bp, C), jnp.float32),
        jax.ShapeDtypeStruct((Bp, D), jnp.float32),
        jax.ShapeDtypeStruct((Bp * C, D), jnp.float32),
    )
    logits, pooled, clsn = pl.pallas_call(
        gliclass_head_kernel,
        out_shape=out_shapes,
        grid_spec=grid_spec,
        compiler_params=pltpu.CompilerParams(
            dimension_semantics=("parallel",),
            vmem_limit_bytes=32 * 1024 * 1024,
        ),
    )(
        text_flat, cls_flat, pool_mat, diag_mask, gather_mat,
        params["w1_text"], params["b1_text"].reshape(1, P),
        params["w2_text"], params["b2_text"].reshape(1, D),
        params["w1_cls"], params["b1_cls"].reshape(1, P),
        params["w2_cls"], params["b2_cls"].reshape(1, D),
        scale,
    )
    return logits[:B], pooled[:B], clsn.reshape(Bp, C, D)[:B]


# ----------------------------------------------------------------------------
# Plain-JAX glue
# ----------------------------------------------------------------------------
def extract_class_features(token_embeds, input_ids, class_token_index, max_c):
    """JAX version of GLiClassBaseModel._extract_class_features (embed_class_token=True).

    Scatters decoder embeddings at class-token positions into a dense [B, max_c, D]
    tensor plus a [B, max_c] mask. Data-dependent scatter stays in plain JAX.
    """
    mask = input_ids == class_token_index                              # [B, Sc]
    pos = jnp.cumsum(mask.astype(jnp.int32), axis=-1) - 1              # slot per class token
    onehot = mask[:, :, None] & (pos[:, :, None] == jnp.arange(max_c)[None, None, :])
    onehot_f = onehot.astype(token_embeds.dtype)                       # [B, Sc, max_c]
    classes_embedding = jnp.einsum("bsc,bsd->bcd", onehot_f, token_embeds)
    classes_embedding_mask = onehot.any(axis=1).astype(jnp.int32)      # [B, max_c]
    return classes_embedding, classes_embedding_mask


def synthetic_backbone(params, input_ids, class_input_ids):
    """Deterministic stand-in for the HF encoder-decoder (see TODO(synk) above)."""
    emb = params["embedding"]                                          # [V, D]
    enc_in = emb[input_ids]                                            # [B, S, D]
    enc_h = jnp.tanh(enc_in @ params["w_enc"] + params["b_enc"])       # encoder_last_hidden_state
    ctx = jnp.mean(enc_h, axis=1, keepdims=True)                       # [B, 1, D]
    dec_in = emb[class_input_ids]                                      # [B, Sc, D]
    dec_h = jnp.tanh(dec_in @ params["w_dec"] + ctx + params["b_dec"])  # last_hidden_state
    return enc_h, dec_h


def gliclass_forward(params, input_ids, class_input_ids, class_token_index, max_c):
    enc_h, dec_h = synthetic_backbone(params, input_ids, class_input_ids)
    classes_embedding, classes_embedding_mask = extract_class_features(
        dec_h, class_input_ids, class_token_index, max_c)
    logits, pooled, cls_n = gliclass_head(enc_h, classes_embedding, params,
                                          params["logit_scale"])
    return logits, pooled, cls_n, classes_embedding_mask


def reference_head(text_emb, cls_emb, params, logit_scale):
    """Pure-JAX reference of the head (expects the same bf16-quantized activations)."""
    eps = 1e-8
    pooled = jnp.mean(text_emb, axis=1)                                # [B, D]
    h = jnp.maximum(pooled @ params["w1_text"] + params["b1_text"], 0.0)
    pooled = h @ params["w2_text"] + params["b2_text"]
    pooled = pooled / jnp.maximum(
        jnp.linalg.norm(pooled, axis=-1, keepdims=True), eps)
    hc = jnp.maximum(cls_emb @ params["w1_cls"] + params["b1_cls"], 0.0)
    cls = hc @ params["w2_cls"] + params["b2_cls"]
    cls = cls / jnp.maximum(jnp.linalg.norm(cls, axis=-1, keepdims=True), eps)
    logits = jnp.sum(pooled[:, None, :] * cls, axis=-1) * logit_scale
    return logits, pooled, cls


# ----------------------------------------------------------------------------
# Parameter init (deterministic, synthetic)
# ----------------------------------------------------------------------------
def init_params(key, vocab, D, P):
    ks = jax.random.split(key, 12)
    sd = 0.05
    return {
        "embedding": jax.random.normal(ks[0], (vocab, D), jnp.float32) * sd,
        "w_enc": jax.random.normal(ks[1], (D, D), jnp.float32) * sd,
        "b_enc": jnp.zeros((D,), jnp.float32),
        "w_dec": jax.random.normal(ks[2], (D, D), jnp.float32) * sd,
        "b_dec": jnp.zeros((D,), jnp.float32),
        # text_projector: Linear(D,P) -> ReLU -> Linear(P,D)
        "w1_text": jax.random.normal(ks[3], (D, P), jnp.float32) * sd,
        "b1_text": jax.random.normal(ks[4], (P,), jnp.float32) * sd,
        "w2_text": jax.random.normal(ks[5], (P, D), jnp.float32) * sd,
        "b2_text": jax.random.normal(ks[6], (D,), jnp.float32) * sd,
        # classes_projector
        "w1_cls": jax.random.normal(ks[7], (D, P), jnp.float32) * sd,
        "b1_cls": jax.random.normal(ks[8], (P,), jnp.float32) * sd,
        "w2_cls": jax.random.normal(ks[9], (P, D), jnp.float32) * sd,
        "b2_cls": jax.random.normal(ks[10], (D,), jnp.float32) * sd,
        "logit_scale": jnp.float32(2.6592),   # config.logit_scale_init_value
    }


if __name__ == "__main__":
    key = jax.random.PRNGKey(0)
    B, S, Sc, D, P = 2, 16, 12, 32, 64
    VOCAB = 100
    CLASS_TOKEN_INDEX = 3
    MAX_C = 4   # class tokens per example (fixed for static shapes)

    pkey, ikey, ckey = jax.random.split(key, 3)
    params = init_params(pkey, VOCAB, D, P)

    # encoder input ids: random non-special tokens
    input_ids = jax.random.randint(ikey, (B, S), 10, VOCAB, dtype=jnp.int32)

    # decoder (class) input ids: <<LABEL>> token followed by 2 label-word tokens, x4
    class_input_ids = jax.random.randint(ckey, (B, Sc), 10, VOCAB, dtype=jnp.int32)
    class_positions = jnp.array([0, 3, 6, 9], dtype=jnp.int32)
    class_input_ids = class_input_ids.at[:, class_positions].set(CLASS_TOKEN_INDEX)

    fwd = jax.jit(functools.partial(gliclass_forward,
                                    class_token_index=CLASS_TOKEN_INDEX, max_c=MAX_C))
    logits, pooled, cls_n, cls_mask = fwd(params, input_ids, class_input_ids)
    jax.block_until_ready((logits, pooled, cls_n, cls_mask))

    # correctness check against a pure-JAX reference of the head (same bf16-quantized
    # activations as the kernel sees; kernel math is f32 so tolerances stay tight).
    enc_h, dec_h = synthetic_backbone(params, input_ids, class_input_ids)
    cls_emb, _ = extract_class_features(dec_h, class_input_ids, CLASS_TOKEN_INDEX, MAX_C)
    enc_q = enc_h.astype(jnp.bfloat16).astype(jnp.float32)
    cls_q = cls_emb.astype(jnp.bfloat16).astype(jnp.float32)
    ref_logits, ref_pooled, ref_cls = reference_head(enc_q, cls_q, params,
                                                     params["logit_scale"])
    assert logits.shape == (B, MAX_C)
    assert pooled.shape == (B, D) and cls_n.shape == (B, MAX_C, D)
    # 1e-4: allows for rsqrt vs sqrt/div and MXU-matmul pooling/scoring reformulation.
    assert jnp.allclose(logits, ref_logits, atol=1e-4, rtol=1e-4)
    assert jnp.allclose(pooled, ref_pooled, atol=1e-4, rtol=1e-4)
    assert jnp.allclose(cls_n, ref_cls, atol=1e-4, rtol=1e-4)

    print("KERNEL_OK")
</pallas_src>

<mosaic_0001>
module attributes {stable_mosaic.version = 11 : i64} {
  func.func @gliclass_head_kernel(%arg0: i32, %arg1: memref<128x32xbf16, #tpu.memory_space<vmem>>, %arg2: memref<32x32xbf16, #tpu.memory_space<vmem>>, %arg3: memref<8x128xf32, #tpu.memory_space<vmem>>, %arg4: memref<8x32xf32, #tpu.memory_space<vmem>>, %arg5: memref<32x4xf32, #tpu.memory_space<vmem>>, %arg6: memref<32x64xf32, #tpu.memory_space<vmem>>, %arg7: memref<1x64xf32, #tpu.memory_space<vmem>>, %arg8: memref<64x32xf32, #tpu.memory_space<vmem>>, %arg9: memref<1x32xf32, #tpu.memory_space<vmem>>, %arg10: memref<32x64xf32, #tpu.memory_space<vmem>>, %arg11: memref<1x64xf32, #tpu.memory_space<vmem>>, %arg12: memref<64x32xf32, #tpu.memory_space<vmem>>, %arg13: memref<1x32xf32, #tpu.memory_space<vmem>>, %arg14: memref<1xf32, #tpu.memory_space<smem>>, %arg15: memref<8x4xf32, #tpu.memory_space<vmem>>, %arg16: memref<8x32xf32, #tpu.memory_space<vmem>>, %arg17: memref<32x32xf32, #tpu.memory_space<vmem>>) attributes {dimension_semantics = [#tpu.dimension_semantics<parallel>], iteration_bounds = array<i64: 1>, scalar_prefetch = 0 : i64, scratch_operands = 0 : i64, tpu.core_type = #tpu.core_type<tc>, window_params = [{transform_indices = @transform_0, window_bounds = array<i64: 128, 32>}, {transform_indices = @transform_1, window_bounds = array<i64: 32, 32>}, {pipeline_mode = #tpu.pipeline_mode<synchronous>, transform_indices = @transform_2, window_bounds = array<i64: 8, 128>}, {pipeline_mode = #tpu.pipeline_mode<synchronous>, transform_indices = @transform_3, window_bounds = array<i64: 8, 32>}, {pipeline_mode = #tpu.pipeline_mode<synchronous>, transform_indices = @transform_4, window_bounds = array<i64: 32, 4>}, {pipeline_mode = #tpu.pipeline_mode<synchronous>, transform_indices = @transform_5, window_bounds = array<i64: 32, 64>}, {pipeline_mode = #tpu.pipeline_mode<synchronous>, transform_indices = @transform_6, window_bounds = array<i64: 1, 64>}, {pipeline_mode = #tpu.pipeline_mode<synchronous>, transform_indices = @transform_7, window_bounds = array<i64: 64, 32>}, {pipeline_mode = #tpu.pipeline_mode<synchronous>, transform_indices = @transform_8, window_bounds = array<i64: 1, 32>}, {pipeline_mode = #tpu.pipeline_mode<synchronous>, transform_indices = @transform_9, window_bounds = array<i64: 32, 64>}, {pipeline_mode = #tpu.pipeline_mode<synchronous>, transform_indices = @transform_10, window_bounds = array<i64: 1, 64>}, {pipeline_mode = #tpu.pipeline_mode<synchronous>, transform_indices = @transform_11, window_bounds = array<i64: 64, 32>}, {pipeline_mode = #tpu.pipeline_mode<synchronous>, transform_indices = @transform_12, window_bounds = array<i64: 1, 32>}, {transform_indices = @transform_13, window_bounds = array<i64: 1>}, {transform_indices = @transform_14, window_bounds = array<i64: 8, 4>}, {transform_indices = @transform_15, window_bounds = array<i64: 8, 32>}, {transform_indices = @transform_16, window_bounds = array<i64: 32, 32>}]} {
    %c0 = arith.constant 0 : index
    %c0_0 = arith.constant 0 : index
    %0 = vector.load %arg1[%c0, %c0_0] : memref<128x32xbf16, #tpu.memory_space<vmem>>, vector<128x32xbf16>
    %1 = arith.extf %0 : vector<128x32xbf16> to vector<128x32xf32>
    %c0_1 = arith.constant 0 : index
    %c0_2 = arith.constant 0 : index
    %2 = vector.load %arg3[%c0_1, %c0_2] : memref<8x128xf32, #tpu.memory_space<vmem>>, vector<8x128xf32>
    %cst = arith.constant dense<0.000000e+00> : vector<8x32xf32>
    %3 = tpu.matmul %2, %1, %cst {dimension_numbers = #tpu.dot_dimension_numbers<[1], [0], [0], [1], [0, 0, 1, 1], [], []>} : vector<8x128xf32>, vector<128x32xf32>, vector<8x32xf32> -> vector<8x32xf32>
    %c0_3 = arith.constant 0 : index
    %c0_4 = arith.constant 0 : index
    %4 = vector.load %arg6[%c0_3, %c0_4] : memref<32x64xf32, #tpu.memory_space<vmem>>, vector<32x64xf32>
    %cst_5 = arith.constant dense<0.000000e+00> : vector<8x64xf32>
    %5 = tpu.matmul %3, %4, %cst_5 {dimension_numbers = #tpu.dot_dimension_numbers<[1], [0], [0], [1], [0, 0, 1, 1], [], []>} : vector<8x32xf32>, vector<32x64xf32>, vector<8x64xf32> -> vector<8x64xf32>
    %c0_6 = arith.constant 0 : index
    %c0_7 = arith.constant 0 : index
    %6 = vector.load %arg7[%c0_6, %c0_7] : memref<1x64xf32, #tpu.memory_space<vmem>>, vector<1x64xf32>
    %7 = vector.broadcast %6 : vector<1x64xf32> to vector<8x64xf32>
    %8 = arith.addf %5, %7 : vector<8x64xf32>
    %cst_8 = arith.constant 0.000000e+00 : f32
    %9 = vector.broadcast %cst_8 : f32 to vector<8x64xf32>
    %10 = arith.maximumf %8, %9 : vector<8x64xf32>
    %c0_9 = arith.constant 0 : index
    %c0_10 = arith.constant 0 : index
    %11 = vector.load %arg8[%c0_9, %c0_10] : memref<64x32xf32, #tpu.memory_space<vmem>>, vector<64x32xf32>
    %cst_11 = arith.constant dense<0.000000e+00> : vector<8x32xf32>
    %12 = tpu.matmul %10, %11, %cst_11 {dimension_numbers = #tpu.dot_dimension_numbers<[1], [0], [0], [1], [0, 0, 1, 1], [], []>} : vector<8x64xf32>, vector<64x32xf32>, vector<8x32xf32> -> vector<8x32xf32>
    %c0_12 = arith.constant 0 : index
    %c0_13 = arith.constant 0 : index
    %13 = vector.load %arg9[%c0_12, %c0_13] : memref<1x32xf32, #tpu.memory_space<vmem>>, vector<1x32xf32>
    %14 = vector.broadcast %13 : vector<1x32xf32> to vector<8x32xf32>
    %15 = arith.addf %12, %14 : vector<8x32xf32>
    %16 = arith.mulf %15, %15 : vector<8x32xf32>
    %cst_14 = arith.constant dense<0.000000e+00> : vector<8xf32>
    %17 = vector.multi_reduction <add>, %16, %cst_14 [1] : vector<8x32xf32> to vector<8xf32>
    %18 = vector.shape_cast %17 : vector<8xf32> to vector<8x1xf32>
    %cst_15 = arith.constant 1.000000e-16 : f32
    %19 = vector.broadcast %cst_15 : f32 to vector<8x1xf32>
    %20 = arith.maximumf %18, %19 : vector<8x1xf32>
    %21 = math.rsqrt %20 : vector<8x1xf32>
    %22 = vector.broadcast %21 : vector<8x1xf32> to vector<8x32xf32>
    %23 = arith.mulf %15, %22 : vector<8x32xf32>
    %c0_16 = arith.constant 0 : index
    %c0_17 = arith.constant 0 : index
    %24 = vector.load %arg2[%c0_16, %c0_17] : memref<32x32xbf16, #tpu.memory_space<vmem>>, vector<32x32xbf16>
    %25 = arith.extf %24 : vector<32x32xbf16> to vector<32x32xf32>
    %c0_18 = arith.constant 0 : index
    %c0_19 = arith.constant 0 : index
    %26 = vector.load %arg10[%c0_18, %c0_19] : memref<32x64xf32, #tpu.memory_space<vmem>>, vector<32x64xf32>
    %cst_20 = arith.constant dense<0.000000e+00> : vector<32x64xf32>
    %27 = tpu.matmul %25, %26, %cst_20 {dimension_numbers = #tpu.dot_dimension_numbers<[1], [0], [0], [1], [0, 0, 1, 1], [], []>} : vector<32x32xf32>, vector<32x64xf32>, vector<32x64xf32> -> vector<32x64xf32>
    %c0_21 = arith.constant 0 : index
    %c0_22 = arith.constant 0 : index
    %28 = vector.load %arg11[%c0_21, %c0_22] : memref<1x64xf32, #tpu.memory_space<vmem>>, vector<1x64xf32>
    %29 = vector.broadcast %28 : vector<1x64xf32> to vector<32x64xf32>
    %30 = arith.addf %27, %29 : vector<32x64xf32>
    %cst_23 = arith.constant 0.000000e+00 : f32
    %31 = vector.broadcast %cst_23 : f32 to vector<32x64xf32>
    %32 = arith.maximumf %30, %31 : vector<32x64xf32>
    %c0_24 = arith.constant 0 : index
    %c0_25 = arith.constant 0 : index
    %33 = vector.load %arg12[%c0_24, %c0_25] : memref<64x32xf32, #tpu.memory_space<vmem>>, vector<64x32xf32>
    %cst_26 = arith.constant dense<0.000000e+00> : vector<32x32xf32>
    %34 = tpu.matmul %32, %33, %cst_26 {dimension_numbers = #tpu.dot_dimension_numbers<[1], [0], [0], [1], [0, 0, 1, 1], [], []>} : vector<32x64xf32>, vector<64x32xf32>, vector<32x32xf32> -> vector<32x32xf32>
    %c0_27 = arith.constant 0 : index
    %c0_28 = arith.constant 0 : index
    %35 = vector.load %arg13[%c0_27, %c0_28] : memref<1x32xf32, #tpu.memory_space<vmem>>, vector<1x32xf32>
    %36 = vector.broadcast %35 : vector<1x32xf32> to vector<32x32xf32>
    %37 = arith.addf %34, %36 : vector<32x32xf32>
    %38 = arith.mulf %37, %37 : vector<32x32xf32>
    %cst_29 = arith.constant dense<0.000000e+00> : vector<32xf32>
    %39 = vector.multi_reduction <add>, %38, %cst_29 [1] : vector<32x32xf32> to vector<32xf32>
    %40 = vector.shape_cast %39 : vector<32xf32> to vector<32x1xf32>
    %cst_30 = arith.constant 1.000000e-16 : f32
    %41 = vector.broadcast %cst_30 : f32 to vector<32x1xf32>
    %42 = arith.maximumf %40, %41 : vector<32x1xf32>
    %43 = math.rsqrt %42 : vector<32x1xf32>
    %44 = vector.broadcast %43 : vector<32x1xf32> to vector<32x32xf32>
    %45 = arith.mulf %37, %44 : vector<32x32xf32>
    %cst_31 = arith.constant dense<0.000000e+00> : vector<8x32xf32>
    %46 = tpu.matmul %23, %45, %cst_31 {dimension_numbers = #tpu.dot_dimension_numbers<[1], [1], [0], [0], [0, 0, 1, 0], [], []>} : vector<8x32xf32>, vector<32x32xf32>, vector<8x32xf32> -> vector<8x32xf32>
    %c0_32 = arith.constant 0 : index
    %c0_33 = arith.constant 0 : index
    %47 = vector.load %arg4[%c0_32, %c0_33] : memref<8x32xf32, #tpu.memory_space<vmem>>, vector<8x32xf32>
    %48 = arith.mulf %46, %47 : vector<8x32xf32>
    %c0_34 = arith.constant 0 : index
    %c0_35 = arith.constant 0 : index
    %49 = vector.load %arg5[%c0_34, %c0_35] : memref<32x4xf32, #tpu.memory_space<vmem>>, vector<32x4xf32>
    %cst_36 = arith.constant dense<0.000000e+00> : vector<8x4xf32>
    %50 = tpu.matmul %48, %49, %cst_36 {dimension_numbers = #tpu.dot_dimension_numbers<[1], [0], [0], [1], [0, 0, 1, 1], [], []>} : vector<8x32xf32>, vector<32x4xf32>, vector<8x4xf32> -> vector<8x4xf32>
    %c0_37 = arith.constant 0 : index
    %51 = memref.load %arg14[%c0_37] : memref<1xf32, #tpu.memory_space<smem>>
    %52 = vector.broadcast %51 : f32 to vector<8x4xf32>
    %53 = arith.mulf %50, %52 : vector<8x4xf32>
    %c0_38 = arith.constant 0 : index
    %c0_39 = arith.constant 0 : index
    %54 = vector.load %arg15[%c0_38, %c0_39] : memref<8x4xf32, #tpu.memory_space<vmem>>, vector<8x4xf32>
    tpu.vector_store %arg15[%c0_38, %c0_39], %53 {strides = array<i32>} : memref<8x4xf32, #tpu.memory_space<vmem>>, vector<8x4xf32>,
    %c0_40 = arith.constant 0 : index
    %c0_41 = arith.constant 0 : index
    %55 = vector.load %arg16[%c0_40, %c0_41] : memref<8x32xf32, #tpu.memory_space<vmem>>, vector<8x32xf32>
    tpu.vector_store %arg16[%c0_40, %c0_41], %23 {strides = array<i32>} : memref<8x32xf32, #tpu.memory_space<vmem>>, vector<8x32xf32>,
    %c0_42 = arith.constant 0 : index
    %c0_43 = arith.constant 0 : index
    %56 = vector.load %arg17[%c0_42, %c0_43] : memref<32x32xf32, #tpu.memory_space<vmem>>, vector<32x32xf32>
    tpu.vector_store %arg17[%c0_42, %c0_43], %45 {strides = array<i32>} : memref<32x32xf32, #tpu.memory_space<vmem>>, vector<32x32xf32>,
    return
  }
  func.func @transform_0(%arg0: i32) -> (i32, i32) {
    %c0_i32 = arith.constant 0 : i32
    %c0_i32_0 = arith.constant 0 : i32
    return %arg0, %c0_i32 : i32, i32
  }
  func.func @transform_1(%arg0: i32) -> (i32, i32) {
    %c0_i32 = arith.constant 0 : i32
    %c0_i32_0 = arith.constant 0 : i32
    return %arg0, %c0_i32 : i32, i32
  }
  func.func @transform_2(%arg0: i32) -> (i32, i32) {
    %c0_i32 = arith.constant 0 : i32
    %c0_i32_0 = arith.constant 0 : i32
    %c0_i32_1 = arith.constant 0 : i32
    return %c0_i32, %c0_i32_0 : i32, i32
  }
  func.func @transform_3(%arg0: i32) -> (i32, i32) {
    %c0_i32 = arith.constant 0 : i32
    %c0_i32_0 = arith.constant 0 : i32
    %c0_i32_1 = arith.constant 0 : i32
    return %c0_i32, %c0_i32_0 : i32, i32
  }
  func.func @transform_4(%arg0: i32) -> (i32, i32) {
    %c0_i32 = arith.constant 0 : i32
    %c0_i32_0 = arith.constant 0 : i32
    %c0_i32_1 = arith.constant 0 : i32
    return %c0_i32, %c0_i32_0 : i32, i32
  }
  func.func @transform_5(%arg0: i32) -> (i32, i32) {
    %c0_i32 = arith.constant 0 : i32
    %c0_i32_0 = arith.constant 0 : i32
    %c0_i32_1 = arith.constant 0 : i32
    return %c0_i32, %c0_i32_0 : i32, i32
  }
  func.func @transform_6(%arg0: i32) -> (i32, i32) {
    %c0_i32 = arith.constant 0 : i32
    %c0_i32_0 = arith.constant 0 : i32
    %c0_i32_1 = arith.constant 0 : i32
    return %c0_i32, %c0_i32_0 : i32, i32
  }
  func.func @transform_7(%arg0: i32) -> (i32, i32) {
    %c0_i32 = arith.constant 0 : i32
    %c0_i32_0 = arith.constant 0 : i32
    %c0_i32_1 = arith.constant 0 : i32
    return %c0_i32, %c0_i32_0 : i32, i32
  }
  func.func @transform_8(%arg0: i32) -> (i32, i32) {
    %c0_i32 = arith.constant 0 : i32
    %c0_i32_0 = arith.constant 0 : i32
    %c0_i32_1 = arith.constant 0 : i32
    return %c0_i32, %c0_i32_0 : i32, i32
  }
  func.func @transform_9(%arg0: i32) -> (i32, i32) {
    %c0_i32 = arith.constant 0 : i32
    %c0_i32_0 = arith.constant 0 : i32
    %c0_i32_1 = arith.constant 0 : i32
    return %c0_i32, %c0_i32_0 : i32, i32
  }
  func.func @transform_10(%arg0: i32) -> (i32, i32) {
    %c0_i32 = arith.constant 0 : i32
    %c0_i32_0 = arith.constant 0 : i32
    %c0_i32_1 = arith.constant 0 : i32
    return %c0_i32, %c0_i32_0 : i32, i32
  }
  func.func @transform_11(%arg0: i32) -> (i32, i32) {
    %c0_i32 = arith.constant 0 : i32
    %c0_i32_0 = arith.constant 0 : i32
    %c0_i32_1 = arith.constant 0 : i32
    return %c0_i32, %c0_i32_0 : i32, i32
  }
  func.func @transform_12(%arg0: i32) -> (i32, i32) {
    %c0_i32 = arith.constant 0 : i32
    %c0_i32_0 = arith.constant 0 : i32
    %c0_i32_1 = arith.constant 0 : i32
    return %c0_i32, %c0_i32_0 : i32, i32
  }
  func.func @transform_13(%arg0: i32) -> i32 {
    %c0_i32 = arith.constant 0 : i32
    %c0_i32_0 = arith.constant 0 : i32
    return %c0_i32 : i32
  }
  func.func @transform_14(%arg0: i32) -> (i32, i32) {
    %c0_i32 = arith.constant 0 : i32
    %c0_i32_0 = arith.constant 0 : i32
    return %arg0, %c0_i32 : i32, i32
  }
  func.func @transform_15(%arg0: i32) -> (i32, i32) {
    %c0_i32 = arith.constant 0 : i32
    %c0_i32_0 = arith.constant 0 : i32
    return %arg0, %c0_i32 : i32, i32
  }
  func.func @transform_16(%arg0: i32) -> (i32, i32) {
    %c0_i32 = arith.constant 0 : i32
    %c0_i32_0 = arith.constant 0 : i32
    return %arg0, %c0_i32 : i32, i32
  }
}

</mosaic_0001>

<bundles_post_ra>
// kernel: gliclass_forward.1
= control target key start
LH: loop header
LB: loop body
LE: loop exit
PB: predicated region body
PF: predicated region fallthrough
CT: control target
= control target key end

     0   :  { %vm112_vm0 = vcmask 261120   ;;  %vm149_vm1 = vcmask 523264   ;;  %s810_s9 = inlined_call_operand.vmem [shape: f32[32,64], index: 9, kind: input, shape index: {}]   ;;  %s811_s0 = inlined_call_operand.vmem [shape: bf16[128,32], index: 0, kind: input, shape index: {}]   ;;  %s812_s1 = inlined_call_operand.vmem [shape: bf16[32,32], index: 1, kind: input, shape index: {}]   ;;  %s813_s11 = inlined_call_operand.vmem [shape: f32[64,32], index: 11, kind: input, shape index: {}]   ;;  %s814_s10 = inlined_call_operand.vmem [shape: f32[1,64], index: 10, kind: input, shape index: {}]   ;;  %s815_s2 = inlined_call_operand.vmem [shape: f32[8,128], index: 2, kind: input, shape index: {}]   ;;  %s816_s12 = inlined_call_operand.vmem [shape: f32[1,32], index: 12, kind: input, shape index: {}]   ;;  %s817_s5 = inlined_call_operand.vmem [shape: f32[32,64], index: 5, kind: input, shape index: {}]   ;;  %s818_s6 = inlined_call_operand.vmem [shape: f32[1,64], index: 6, kind: input, shape index: {}]   ;;  %s819_s7 = inlined_call_operand.vmem [shape: f32[64,32], index: 7, kind: input, shape index: {}]   ;;  %s820_s8 = inlined_call_operand.vmem [shape: f32[1,32], index: 8, kind: input, shape index: {}]   ;;  %s821_s16 = inlined_call_operand.vmem [shape: f32[32,32], index: 16, kind: output, shape index: {2}]   ;;  %s822_s4 = inlined_call_operand.vmem [shape: f32[32,4], index: 4, kind: input, shape index: {}]   ;;  %s823_s15 = inlined_call_operand.vmem [shape: f32[8,32], index: 15, kind: output, shape index: {1}]   ;;  %s824_s3 = inlined_call_operand.vmem [shape: f32[8,32], index: 3, kind: input, shape index: {}]   ;;  %s825_s13 = inlined_call_operand.<no memory space> [shape: f32[1], index: 13, kind: input, shape index: {}]   ;;  %s826_s14 = inlined_call_operand.vmem [shape: f32[8,4], index: 14, kind: output, shape index: {0}]  }
   0x1   :  { %828 = sst [smem:[#allocation3_spill]] %s810_s9  ;;  %v515_v1 = vld [vmem:[%s811_s0 + $0x38] sm:$0xff]   ;;  %v514_v5 = vld [vmem:[%s811_s0 + $0x30] sm:$0xff]   ;;  %v502_v7 = vld [vmem:[%s812_s1] sm:$0xff]  }
   0x2   :  { %s829_s23 = sld [smem:[#allocation3_spill]]  ;;  %v500_v3 = vunpack.c.h.bf16 %v515_v1  ;;  %v499_v4 = vunpack.c.l.bf16 %v515_v1  ;;  %v496_v8 = vunpack.c.h.bf16 %v514_v5  ;;  %v503_v10 = vunpack.c.l.bf16 %v502_v7  ;;  %v513_v11 = vld [vmem:[%s811_s0 + $0x28] sm:$0xff]   ;;  %v257_v13 = vld [vmem:[%s813_s11 + $0x38] sm:$0xff]  ;;  %v256_v14 = vld [vmem:[%s813_s11 + $0x30] sm:$0xff] }
   0x3   :  { %v495_v12 = vunpack.c.l.bf16 %v514_v5  ;;  %282 = vmatpush.msra.mxu1 %v257_v13  ;;  %v492_v15 = vunpack.c.h.bf16 %v513_v11  ;;  %v255_v16 = vld [vmem:[%s813_s11 + $0x28] sm:$0xff]  ;;  %v512_v17 = vld [vmem:[%s811_s0 + $0x20] sm:$0xff]   ;;  %v491_v18 = vunpack.c.l.bf16 %v513_v11  ;;  %v253_v21 = vld [vmem:[%s813_s11 + $0x18] sm:$0xff]  ;;  %v504_v22 = vunpack.c.h.bf16 %v502_v7 }
   0x4   :  { %84 = vmatpush.msra.mxu0 %v500_v3  ;;  %v254_v19 = vld [vmem:[%s813_s11 + $0x20] sm:$0xff]  ;;  %v488_v20 = vunpack.c.h.bf16 %v512_v17  ;;  %v511_v23 = vld [vmem:[%s811_s0 + $0x18] sm:$0xff]   ;;  %v487_v24 = vunpack.c.l.bf16 %v512_v17  ;;  %v510_v26 = vld [vmem:[%s811_s0 + $0x10] sm:$0xff]  }
   0x5   :  { %283 = vmatpush.msra.mxu1 %v256_v14  ;;  %v484_v25 = vunpack.c.h.bf16 %v511_v23  ;;  %v483_v27 = vunpack.c.l.bf16 %v511_v23  ;;  %v516_v28 = vld [vmem:[%s812_s1 + $0x8] sm:$0xff]   ;;  %v480_v29 = vunpack.c.h.bf16 %v510_v26  ;;  %v479_v32 = vunpack.c.l.bf16 %v510_v26  ;;  %v470_v34 = vld [vmem:[%s811_s0] sm:$0xff]   ;;  %v252_v40 = vld [vmem:[%s813_s11 + $0x10] sm:$0xff] }
   0x6   :  { %85 = vmatpush.msra.mxu0 %v499_v4  ;;  %v507_v30 = vunpack.c.l.bf16 %v516_v28  ;;  %v509_v31 = vld [vmem:[%s811_s0 + $0x8] sm:$0xff]   ;;  %v472_v36 = vunpack.c.h.bf16 %v470_v34  ;;  %v508_v37 = vunpack.c.h.bf16 %v516_v28  ;;  %v471_v38 = vunpack.c.l.bf16 %v470_v34  ;;  %v83_v39 = vld [vmem:[%s815_s2] sm:$0xff]  ;;  %v107_v43 = vld [vmem:[%s817_s5 + $0x18] sm:$0xff] }
   0x7   :  { %284 = vmatpush.msra.mxu1 %v255_v16  ;;  %v476_v33 = vunpack.c.h.bf16 %v509_v31  ;;  %v475_v35 = vunpack.c.l.bf16 %v509_v31  ;;  %v251_v41 = vld [vmem:[%s813_s11 + $0x8] sm:$0xff]  ;;  %v250_v42 = vld [vmem:[%s813_s11] sm:$0xff]  ;;  %v106_v44 = vld [vmem:[%s817_s5 + $0x10] sm:$0xff]  ;;  %128 = vmatpush.msra.mxu2 %v107_v43 }
   0x8   :  { %v200_v0 = vld [vmem:[%s829_s23 + $0x18] sm:$0xff]  ;;  %v199_v2 = vld [vmem:[%s829_s23 + $0x10] sm:$0xff]  ;;  %v198_v6 = vld [vmem:[%s829_s23 + $0x8] sm:$0xff]  ;;  %86 = vmatpush.msra.mxu0 %v496_v8 }
   0x9   :  { %229 = vmatpush.msra.mxu3 %v200_v0  ;;  %v197_v9 = vld [vmem:[%s829_s23] sm:$0xff]  ;;  %285 = vmatpush.msra.mxu1 %v254_v19  ;;  %v105_v45 = vld [vmem:[%s817_s5 + $0x8] sm:$0xff]  ;;  %v144_v61 = vld [vmem:[%s819_s7 + $0x38] sm:$0xff] }
   0xa   :  { %87 = vmatpush.msra.mxu0 %v495_v12  ;;  %129 = vmatpush.msra.mxu2 %v106_v44  ;;  %v104_v46 = vld [vmem:[%s817_s5] sm:$0xff]  ;;  %v143_v62 = vld [vmem:[%s819_s7 + $0x30] sm:$0xff]  ;;  %v142_v63 = vld [vmem:[%s819_s7 + $0x28] sm:$0xff] }
   0xb   :  { %230 = vmatpush.msra.mxu3 %v199_v2  ;;  %286 = vmatpush.msra.mxu1 %v253_v21  ;;  %v517_v47 = vld [vmem:[%s814_s10] ss:$0 sm:$0xff]  ;;  %v140_v1 = vld [vmem:[%s819_s7 + $0x18] sm:$0xff]  ;;  %v139_v2 = vld [vmem:[%s819_s7 + $0x10] sm:$0xff] }
   0xc   :  { %88 = vmatpush.msra.mxu0 %v492_v15  ;;  %130 = vmatpush.msra.mxu2 %v105_v45  ;;  %v141_v0 = vld [vmem:[%s819_s7 + $0x20] sm:$0xff]  ;;  %v138_v3 = vld [vmem:[%s819_s7 + $0x8] sm:$0xff] }
   0xd   :  { %231 = vmatpush.msra.mxu3 %v198_v6  ;;  %287 = vmatpush.msra.mxu1 %v252_v40  ;;  %v137_v4 = vld [vmem:[%s819_s7] sm:$0xff] }
   0xe   :  { %89 = vmatpush.msra.mxu0 %v491_v18  ;;  %131 = vmatpush.msra.mxu2 %v104_v46  ;;  %v518_v6 = vld [vmem:[%s816_s12] ss:$0 sm:$0xff] }
   0xf   :  { %232 = vmatpush.msra.mxu3 %v197_v9  ;;  %288 = vmatpush.msra.mxu1 %v251_v41  ;;  %v519_v15 = vld [vmem:[%s818_s6] ss:$0 sm:$0xff] }
  0x10   :  { %455 = vmatmul.msk.f32.vlgmr.msra.gmra.mxu3 %vm112_vm0, %v503_v10  ;;  %90 = vmatpush.msra.mxu0 %v488_v20 }
  0x11   :  { %289 = vmatpush.msra.mxu1 %v250_v42  ;;  %161 = vmatpush.msrb.mxu2 %v144_v61 }
  0x12   :  { %91 = vmatpush.msra.mxu0 %v487_v24 }
  0x13   :  { %162 = vmatpush.msrb.mxu2 %v143_v62 }
  0x14   :  { %92 = vmatpush.msra.mxu0 %v484_v25 }
  0x15   :  { %163 = vmatpush.msrb.mxu2 %v142_v63 }
  0x16   :  { %93 = vmatpush.msra.mxu0 %v483_v27 }
  0x17   :  { %164 = vmatpush.msrb.mxu2 %v141_v0 }
  0x18   :  { %456 = vmatmul.msk.f32.gmra.mxu3 %vm112_vm0, %v504_v22  ;;  %94 = vmatpush.msra.mxu0 %v480_v29 }
  0x19   :  { %165 = vmatpush.msrb.mxu2 %v140_v1 }
  0x1a   :  { %95 = vmatpush.msra.mxu0 %v479_v32 }
  0x1b   :  { %166 = vmatpush.msrb.mxu2 %v139_v2 }
  0x1c   :  { %96 = vmatpush.msra.mxu0 %v476_v33 }
  0x1d   :  { %167 = vmatpush.msrb.mxu2 %v138_v3 }
  0x1e   :  { %97 = vmatpush.msra.mxu0 %v475_v35 }
  0x1f   :  { %168 = vmatpush.msrb.mxu2 %v137_v4 }
  0x20   :  { %457 = vmatmul.msk.f32.gmra.mxu3 %vm112_vm0, %v507_v30  ;;  %98 = vmatpush.msra.mxu0 %v472_v36 }
  0x22   :  { %99 = vmatpush.msra.mxu0 %v471_v38 }
  0x23   :  { %100 = vmatmul.f32.vlgmr.msra.gmra.mxu0 %v83_v39 }
  0x28   :  { %458 = vmatmul.msk.f32.gmra.mxu3 %vm112_vm0, %v508_v37 }
  0x93   :  { %v234_v48 = vpop.f32.mrf.mxu3 }
  0x94   :  { %v235_v49 = vadd.f32 %v517_v47, %v234_v48 }
  0x96   :  { %v246_v50 = vmax.f32 %v235_v49, 0.0 }
  0x98   :  { %459 = vmatmul.msk.f32.vlgmr.msra.gmra.mxu1 %vm149_vm1, %v246_v50  ;;  %v520_v50 = vld [vmem:[%s820_s8] ss:$0 sm:$0xff] }
  0x9b   :  { %v237_v51 = vpop.f32.mrf.mxu3 }
  0x9c   :  { %v238_v52 = vadd.f32 %v517_v47, %v237_v51 }
  0x9e   :  { %v247_v53 = vmax.f32 %v238_v52, 0.0 }
  0xa0   :  { %460 = vmatmul.msk.f32.gmra.mxu1 %vm149_vm1, %v247_v53  ;;  %v101_v57 = vpop.f32.mrf.mxu0 }
  0xa1   :  { %453 = vmatmul.msk.f32.vlgmr.msra.gmra.mxu2 %vm112_vm0, %v101_v57 }
  0xa3   :  { %v240_v54 = vpop.f32.mrf.mxu3 }
  0xa4   :  { %v241_v55 = vadd.f32 %v517_v47, %v240_v54 }
  0xa6   :  { %v248_v56 = vmax.f32 %v241_v55, 0.0 }
  0xa8   :  { %461 = vmatmul.msk.f32.gmra.mxu1 %vm149_vm1, %v248_v56 }
  0xab   :  { %v243_v58 = vpop.f32.mrf.mxu3 }
  0xac   :  { %v244_v59 = vadd.f32 %v517_v47, %v243_v58 }
  0xae   :  { %v249_v60 = vmax.f32 %v244_v59, 0.0 }
  0xb0   :  { %462 = vmatmul.msk.f32.gmra.mxu1 %vm149_vm1, %v249_v60 }
 0x115   :  { %v291_v5 = vpop.f32.mrf.mxu1 }
 0x116   :  { %v736_v9 = vadd.f32 %v518_v6, %v291_v5 }
 0x118   :  { %v303_v12 = vmul.f32 %v736_v9, %v736_v9 }
 0x11a   :  { %v307_v14 = vsel %vm112_vm0, %v303_v12, 0.0 }
 0x11d   :  { %v294_v7 = vpop.f32.mrf.mxu1 }
 0x11e   :  { %v295_v8 = vadd.f32 %v518_v6, %v294_v7  ;;  %v407_v7 = vld [vmem:[%s822_s4 + $0x18] sm:$0xff] }
 0x11f   :  { %423 = vmatpush.msrb.mxu0 %v407_v7 }
 0x120   :  { %v304_v10 = vmul.f32 %v295_v8, %v295_v8 }
 0x122   :  { %v310_v11 = vsel %vm112_vm0, %v304_v10, 0.0 }
 0x123   :  { %311 = vadd.xlane.f32.xlu1 %v310_v11 }
 0x124   :  { %v133_v16 = vpop.f32.mrf.mxu2 }
 0x125   :  { %v297_v13 = vpop.f32.mrf.mxu1  ;;  %v134_v17 = vadd.f32 %v519_v15, %v133_v16 }
 0x126   :  { %v747_v21 = vadd.f32 %v518_v6, %v297_v13 }
 0x127   :  { %v136_v19 = vmax.f32 %v134_v17, 0.0 }
 0x128   :  { %v305_v24 = vmul.f32 %v747_v21, %v747_v21 }
 0x129   :  { %454 = vmatmul.msk.f32.vlgmr.msrb.gmra.mxu2 %vm149_vm1, %v136_v19 }
 0x12a   :  { %v313_v25 = vsel %vm112_vm0, %v305_v24, 0.0  ;;  %v432_v24 = vstv %s825_s13 }
 0x12b   :  { %308 = vadd.xlane.f32.xlu1 %v307_v14 }
 0x12d   :  { %v300_v18 = vpop.f32.mrf.mxu1 }
 0x12e   :  { %v745_v20 = vadd.f32 %v518_v6, %v300_v18 }
 0x130   :  { %v306_v22 = vmul.f32 %v745_v20, %v745_v20 }
 0x132   :  { %v316_v23 = vsel %vm112_vm0, %v306_v22, 0.0 }
 0x133   :  { %317 = vadd.xlane.f32.xlu0 %v316_v23 }
 0x13b   :  { %314 = vadd.xlane.f32.xlu0 %v313_v25 }
 0x196   :  { %v312_v26 = vpop.xlane.xlu1 %311 }
 0x197   :  { %v320_v27 = vmax.f32 %v312_v26, 1e-16 }
 0x199   :  { %521 = vrsqrt.f32 %v320_v27  ;;  %vm339_vm2 = vweird.f32 %v320_v27 }
 0x19e   :  { %v309_v28 = vpop.xlane.xlu1 %308 }
 0x19f   :  { %v522_v29 = vpop.eup %521  ;;  %v319_v30 = vmax.f32 %v309_v28, 1e-16 }
 0x1a0   :  { %v334_v31 = vmul.f32 %v522_v29, %v320_v27  ;;  %vm340_vm3 = vweird.f32 %v522_v29 }
 0x1a1   :  { %523 = vrsqrt.f32 %v319_v30  ;;  %vm341_vm4 = vmor %vm339_vm2, %vm340_vm3  ;;  %vm329_vm5 = vweird.f32 %v319_v30  ;;  %vm434_vm2 = vcmask 31744  }
 0x1a2   :  { %v335_v32 = vmul.f32 %v522_v29, %v334_v31 }
 0x1a4   :  { %v336_v33 = vmul.f32 0.5, %v335_v32 }
 0x1a6   :  { %v337_v34 = vsub.f32 1.5, %v336_v33  ;;  %v318_v35 = vpop.xlane.xlu0 %317 }
 0x1a7   :  { %v524_v36 = vpop.eup %523  ;;  %v322_v37 = vmax.f32 %v318_v35, 1e-16 }
 0x1a8   :  { %v338_v38 = vmul.f32 %v522_v29, %v337_v34  ;;  %v324_v39 = vmul.f32 %v524_v36, %v319_v30  ;;  %vm330_vm6 = vweird.f32 %v524_v36 }
 0x1a9   :  { %525 = vrsqrt.f32 %v322_v37  ;;  %vm331_vm7 = vmor %vm329_vm5, %vm330_vm6  ;;  %vm359_vm8 = vweird.f32 %v322_v37 }
 0x1aa   :  { %v342_v40 = vsel %vm341_vm4, %v522_v29, %v338_v38  ;;  %v325_v41 = vmul.f32 %v524_v36, %v324_v39 }
 0x1ab   :  { %v364_v42 = vmul.f32 %v342_v40, %v295_v8  ;;  %v406_v8 = vld [vmem:[%s822_s4 + $0x10] sm:$0xff] }
 0x1ac   :  { %v326_v43 = vmul.f32 0.5, %v325_v41  ;;  %v170_v53 = vpop.f32.mrf.mxu2  ;;  %424 = vmatpush.msrb.mxu0 %v406_v8 }
 0x1ad   :  { %438 = vst.msk [vmem:[%s821_s16 + $0x8] sm:$0xff] %vm112_vm0, %v364_v42  ;;  %v171_v56 = vadd.f32 %v520_v50, %v170_v53 }
 0x1ae   :  { %v327_v44 = vsub.f32 1.5, %v326_v43  ;;  %v315_v45 = vpop.xlane.xlu0 %314 }
 0x1af   :  { %v526_v46 = vpop.eup %525  ;;  %v321_v47 = vmax.f32 %v315_v45, 1e-16  ;;  %v173_v58 = vmul.f32 %v171_v56, %v171_v56 }
 0x1b0   :  { %v328_v48 = vmul.f32 %v524_v36, %v327_v44  ;;  %v354_v49 = vmul.f32 %v526_v46, %v322_v37  ;;  %vm360_vm9 = vweird.f32 %v526_v46 }
 0x1b1   :  { %527 = vrsqrt.f32 %v321_v47  ;;  %vm361_vm10 = vmor %vm359_vm8, %vm360_vm9  ;;  %v174_v62 = vsel %vm112_vm0, %v173_v58, 0.0  ;;  %vm349_vm11 = vweird.f32 %v321_v47 }
 0x1b2   :  { %v332_v51 = vsel %vm331_vm7, %v524_v36, %v328_v48  ;;  %v355_v52 = vmul.f32 %v526_v46, %v354_v49  ;;  %175 = vadd.xlane.f32.xlu2 %v174_v62 }
 0x1b3   :  { %v363_v54 = vmul.f32 %v332_v51, %v736_v9  ;;  %v405_v9 = vld [vmem:[%s822_s4 + $0x8] sm:$0xff] }
 0x1b4   :  { %v356_v55 = vmul.f32 0.5, %v355_v52  ;;  %425 = vmatpush.msrb.mxu0 %v405_v9 }
 0x1b5   :  { %437 = vst.msk [vmem:[%s821_s16] sm:$0xff] %vm112_vm0, %v363_v54 }
 0x1b6   :  { %v357_v57 = vsub.f32 1.5, %v356_v55 }
 0x1b7   :  { %v528_v59 = vpop.eup %527 }
 0x1b8   :  { %v358_v60 = vmul.f32 %v526_v46, %v357_v57  ;;  %v344_v61 = vmul.f32 %v528_v59, %v321_v47  ;;  %vm350_vm12 = vweird.f32 %v528_v59 }
 0x1b9   :  { %vm351_vm13 = vmor %vm349_vm11, %vm350_vm12 }
 0x1ba   :  { %v362_v63 = vsel %vm361_vm10, %v526_v46, %v358_v60  ;;  %v345_v0 = vmul.f32 %v528_v59, %v344_v61 }
 0x1bb   :  { %v366_v1 = vmul.f32 %v362_v63, %v745_v20  ;;  %v404_v20 = vld [vmem:[%s822_s4] sm:$0xff] }
 0x1bc   :  { %v346_v2 = vmul.f32 0.5, %v345_v0  ;;  %426 = vmatpush.msrb.mxu0 %v404_v20 }
 0x1bd   :  { %440 = vst.msk [vmem:[%s821_s16 + $0x18] sm:$0xff] %vm112_vm0, %v366_v1  ;;  %463 = vmatpush.xpose.msk.msra.mxu2 %vm112_vm0, %v366_v1 }
 0x1be   :  { %v347_v3 = vsub.f32 1.5, %v346_v2 }
 0x1c0   :  { %v348_v4 = vmul.f32 %v528_v59, %v347_v3 }
 0x1c2   :  { %v352_v5 = vsel %vm351_vm13, %v528_v59, %v348_v4 }
 0x1c3   :  { %v365_v6 = vmul.f32 %v352_v5, %v747_v21  ;;  %v402_v21 = vld [vmem:[%s824_s3] sm:$0xff] }
 0x1c5   :  { %464 = vmatpush.xpose.msk.msra.mxu2 %vm112_vm0, %v365_v6  ;;  %439 = vst.msk [vmem:[%s821_s16 + $0x10] sm:$0xff] %vm112_vm0, %v365_v6 }
 0x1c9   :  { %465 = vmatpush.xpose.msk.msra.mxu2 %vm112_vm0, %v364_v42 }
 0x1cd   :  { %466 = vmatpush.xpose.msk.msra.mxu2 %vm112_vm0, %v363_v54 }
 0x225   :  { %v176_v10 = vpop.xlane.xlu2 %175 }
 0x226   :  { %v177_v11 = vmax.f32 %v176_v10, 1e-16 }
 0x228   :  { %529 = vrsqrt.f32 %v177_v11  ;;  %vm184_vm15 = vweird.f32 %v177_v11 }
 0x22e   :  { %v530_v12 = vpop.eup %529 }
 0x22f   :  { %v179_v13 = vmul.f32 %v530_v12, %v177_v11  ;;  %vm185_vm14 = vweird.f32 %v530_v12 }
 0x230   :  { %vm186_vm1 = vmor %vm184_vm15, %vm185_vm14 }
 0x231   :  { %v180_v14 = vmul.f32 %v530_v12, %v179_v13 }
 0x233   :  { %v181_v15 = vmul.f32 0.5, %v180_v14 }
 0x235   :  { %v182_v16 = vsub.f32 1.5, %v181_v15 }
 0x237   :  { %v183_v17 = vmul.f32 %v530_v12, %v182_v16 }
 0x239   :  { %v187_v18 = vsel %vm186_vm1, %v530_v12, %v183_v17 }
 0x23a   :  { %v188_v19 = vmul.f32 %v187_v18, %v171_v56 }
 0x23c   :  { %436 = vst.msk [vmem:[%s823_s15] sm:$0xff] %vm112_vm0, %v188_v19  ;;  %467 = vmatmul.msk.f32.vlgmr.msra.gmra.mxu2 %vm112_vm0, %v188_v19 }
 0x2bf   :  { %v399_v22 = vpop.f32.mrf.mxu2 }
 0x2c0   :  { %v403_v23 = vmul.f32 %v402_v21, %v399_v22 }
 0x2c2   :  { %468 = vmatmul.msk.f32.vlgmr.msrb.gmra.mxu0 %vm112_vm0, %v403_v23 }
 0x33f   :  { %v428_v25 = vpop.f32.mrf.mxu0 }
 0x340   :  { %v433_v26 = vmul.f32 %v432_v24, %v428_v25 }
 0x342   :  { %435 = vst.msk [vmem:[%s826_s14] sm:$0xff] %vm434_vm2, %v433_v26 }

</bundles_post_ra>
